<compile_context>
chip_gen: v5e
topology: v5e:2x2
jax: 0.10.0
libtpu: 0.0.40
codegen_flags: <defaults>
</compile_context>

<pallas_src>
import functools

import jax
import jax.numpy as jnp
from jax.experimental import pallas as pl
from jax.experimental.pallas import tpu as pltpu

_LANE = 128
_SUBLANE = 8


def _round_up(x: int, m: int) -> int:
    return ((x + m - 1) // m) * m


def qnetwork_kernel(x_ref, w1_ref, b1_ref, w2_ref, b2_ref, w3_ref, b3_ref, o_ref):
    """Fused forward for one batch tile: relu(relu(x@W1+b1)@W2+b2)@W3+b3.

    Matmul operands take the dtype of the weights (bf16 on the fast path); all
    accumulation (preferred_element_type), bias-adds and ReLUs stay in f32.
    """
    mm_dtype = w1_ref.dtype
    x = x_ref[...].astype(mm_dtype)
    # Hoisted bias reads (single (1, N) load each; lane-broadcast in the add).
    b1 = b1_ref[...]
    b2 = b2_ref[...]
    b3 = b3_ref[...]

    h1 = jnp.dot(x, w1_ref[...], preferred_element_type=jnp.float32) + b1
    h1 = jnp.maximum(h1, 0.0)
    h2 = jnp.dot(h1.astype(mm_dtype), w2_ref[...],
                 preferred_element_type=jnp.float32) + b2
    h2 = jnp.maximum(h2, 0.0)
    o = jnp.dot(h2.astype(mm_dtype), w3_ref[...],
                preferred_element_type=jnp.float32) + b3
    o_ref[...] = o.astype(o_ref.dtype)


@functools.partial(jax.jit, static_argnames=("block_m", "use_bf16"))
def qnetwork_forward(state, params, *, block_m: int = 2048, use_bf16: bool = True):
    """state: (B, state_size) f32 -> (B, action_size) f32."""
    w1, b1, w2, b2, w3, b3 = params
    B, K = state.shape
    H = w1.shape[1]
    A = w3.shape[1]

    # --- Lane-dense output: pad the last-layer output dim to a multiple of 128. ---
    A_pad = _round_up(max(A, _LANE), _LANE)
    if A_pad != A:
        w3p = jnp.zeros((w3.shape[0], A_pad), w3.dtype).at[:, :A].set(w3)
        b3p = jnp.zeros((1, A_pad), b3.dtype).at[:, :A].set(b3)
    else:
        w3p, b3p = w3, b3

    # --- Matmul-operand dtype (bf16 fast path, f32 exact path). Biases stay f32. ---
    mm_dtype = jnp.bfloat16 if use_bf16 else jnp.float32
    out_dtype = jnp.bfloat16 if use_bf16 else jnp.float32
    w1c = w1.astype(mm_dtype)
    w2c = w2.astype(mm_dtype)
    w3c = w3p.astype(mm_dtype)

    # --- Tile selection: split B into n roughly-equal sublane-aligned tiles. ---
    n_steps = pl.cdiv(B, block_m)
    if B >= 512:
        # v7x has 2 TensorCores: guarantee >=2 "parallel" grid steps for large batches.
        n_steps = max(n_steps, 2)
    tm = _round_up(pl.cdiv(B, n_steps), _SUBLANE)   # always a multiple of 8
    B_pad = n_steps * tm
    if B_pad != B:
        xp = jnp.zeros((B_pad, K), state.dtype).at[:B, :].set(state)
    else:
        xp = state

    grid = (n_steps,)

    # x / out tiled over batch; weights & biases resident across all grid steps
    # (constant index_maps -> fetched once, stay in VMEM).
    x_spec = pl.BlockSpec((tm, K), lambda i: (i, 0))
    out_spec = pl.BlockSpec((tm, A_pad), lambda i: (i, 0))
    resident = lambda a: pl.BlockSpec(a.shape, lambda i: (0,) * a.ndim)

    # --- VMEM budget from the real working set (no fixed fudge for temporaries). ---
    f32 = 4
    mm_item = jnp.dtype(mm_dtype).itemsize
    out_item = jnp.dtype(out_dtype).itemsize
    param_bytes = 2 * (int(w1c.size + w2c.size + w3c.size) * mm_item
                       + int(b1.size + b2.size + b3p.size) * f32)
    tile_bytes = 2 * tm * K * f32 + 2 * tm * A_pad * out_item          # dbl-buffered x/out
    tmp_bytes = tm * H * (2 * f32 + 2 * mm_item) + tm * A_pad * f32    # h1,h2 (+casts), o
    vmem_limit = int(min(max(param_bytes + tile_bytes + tmp_bytes + (2 << 20), 8 << 20),
                         48 << 20))

    flops = 2 * B_pad * (K * H + H * H + H * A_pad)
    bytes_accessed = int(xp.size) * f32 \
        + int(w1c.size + w2c.size + w3c.size) * mm_item \
        + int(b1.size + b2.size + b3p.size) * f32 \
        + B_pad * A_pad * out_item

    out = pl.pallas_call(
        qnetwork_kernel,
        out_shape=jax.ShapeDtypeStruct((B_pad, A_pad), out_dtype),
        grid=grid,
        in_specs=[x_spec, resident(w1c), resident(b1), resident(w2c), resident(b2),
                  resident(w3c), resident(b3p)],
        out_specs=out_spec,
        compiler_params=pltpu.CompilerParams(
            dimension_semantics=("parallel",),
            vmem_limit_bytes=vmem_limit,
        ),
        cost_estimate=pl.CostEstimate(flops=flops, transcendentals=0,
                                      bytes_accessed=int(bytes_accessed)),
    )(xp, w1c, b1, w2c, b2, w3c, b3p)

    return out[:B, :A].astype(jnp.float32)


def init_params(key, state_size, action_size, hidden=128):
    """Deterministic init mimicking torch.nn.Linear default (uniform +/- 1/sqrt(fan_in))."""
    ks = jax.random.split(key, 6)

    def lin(kw, kb, fan_in, fan_out):
        bound = 1.0 / jnp.sqrt(fan_in)
        w = jax.random.uniform(kw, (fan_in, fan_out), jnp.float32, -bound, bound)
        b = jax.random.uniform(kb, (1, fan_out), jnp.float32, -bound, bound)
        return w, b

    w1, b1 = lin(ks[0], ks[1], state_size, hidden)
    w2, b2 = lin(ks[2], ks[3], hidden, hidden)
    w3, b3 = lin(ks[4], ks[5], hidden, action_size)
    return (w1, b1, w2, b2, w3, b3)


def qnetwork_ref(state, params):
    """Pure-JAX f32 reference for correctness check."""
    w1, b1, w2, b2, w3, b3 = params
    h1 = jnp.maximum(state @ w1 + b1, 0.0)
    h2 = jnp.maximum(h1 @ w2 + b2, 0.0)
    return h2 @ w3 + b3


if __name__ == "__main__":
    key = jax.random.PRNGKey(0)
    k_param, k_state, k_big = jax.random.split(key, 3)

    batch, state_size, action_size = 2, 8, 4
    params = init_params(k_param, state_size, action_size)

    # Small inference-style batch (exercises batch/lane padding path).
    state = jax.random.normal(k_state, (batch, state_size), jnp.float32)
    ref = qnetwork_ref(state, params)

    # Exact f32-operand path: bit-level agreement with the pure-JAX/PyTorch math.
    out_f32 = jax.block_until_ready(qnetwork_forward(state, params, use_bf16=False))
    assert out_f32.shape == (batch, action_size), out_f32.shape
    assert jnp.allclose(out_f32, ref, atol=1e-5, rtol=1e-5), (out_f32, ref)

    # Default fast path: bf16 MXU operands, f32 accumulation (relaxed tolerance).
    out_bf16 = jax.block_until_ready(qnetwork_forward(state, params))
    assert out_bf16.shape == (batch, action_size), out_bf16.shape
    assert jnp.allclose(out_bf16, ref, atol=5e-2, rtol=5e-2), (out_bf16, ref)

    # Ragged batch: B=300 now pads only to 304 (one 304-row tile).
    big_batch = 300
    state_big = jax.random.normal(k_big, (big_batch, state_size), jnp.float32)
    ref_big = qnetwork_ref(state_big, params)
    out_big = jax.block_until_ready(qnetwork_forward(state_big, params))
    assert out_big.shape == (big_batch, action_size), out_big.shape
    assert jnp.allclose(out_big, ref_big, atol=5e-2, rtol=5e-2)

    # Training-style batch: >=2 grid steps on the "parallel" batch axis (v7x megacore).
    train_batch = 1500
    state_tr = jax.random.normal(jax.random.PRNGKey(1), (train_batch, state_size),
                                 jnp.float32)
    ref_tr = qnetwork_ref(state_tr, params)
    out_tr = jax.block_until_ready(qnetwork_forward(state_tr, params))
    assert out_tr.shape == (train_batch, action_size), out_tr.shape
    assert jnp.allclose(out_tr, ref_tr, atol=5e-2, rtol=5e-2)

    print("KERNEL_OK")
</pallas_src>

<mosaic_0001>
module attributes {stable_mosaic.version = 11 : i64} {
  func.func @qnetwork_kernel(%arg0: i32, %arg1: memref<8x8xf32, #tpu.memory_space<vmem>>, %arg2: memref<8x128xf32, #tpu.memory_space<vmem>>, %arg3: memref<1x128xf32, #tpu.memory_space<vmem>>, %arg4: memref<128x128xf32, #tpu.memory_space<vmem>>, %arg5: memref<1x128xf32, #tpu.memory_space<vmem>>, %arg6: memref<128x128xf32, #tpu.memory_space<vmem>>, %arg7: memref<1x128xf32, #tpu.memory_space<vmem>>, %arg8: memref<8x128xf32, #tpu.memory_space<vmem>>) attributes {dimension_semantics = [#tpu.dimension_semantics<parallel>], iteration_bounds = array<i64: 1>, scalar_prefetch = 0 : i64, scratch_operands = 0 : i64, tpu.core_type = #tpu.core_type<tc>, window_params = [{transform_indices = @transform_0, window_bounds = array<i64: 8, 8>}, {pipeline_mode = #tpu.pipeline_mode<synchronous>, transform_indices = @transform_1, window_bounds = array<i64: 8, 128>}, {pipeline_mode = #tpu.pipeline_mode<synchronous>, transform_indices = @transform_2, window_bounds = array<i64: 1, 128>}, {pipeline_mode = #tpu.pipeline_mode<synchronous>, transform_indices = @transform_3, window_bounds = array<i64: 128, 128>}, {pipeline_mode = #tpu.pipeline_mode<synchronous>, transform_indices = @transform_4, window_bounds = array<i64: 1, 128>}, {pipeline_mode = #tpu.pipeline_mode<synchronous>, transform_indices = @transform_5, window_bounds = array<i64: 128, 128>}, {pipeline_mode = #tpu.pipeline_mode<synchronous>, transform_indices = @transform_6, window_bounds = array<i64: 1, 128>}, {transform_indices = @transform_7, window_bounds = array<i64: 8, 128>}]} {
    %c0 = arith.constant 0 : index
    %c0_0 = arith.constant 0 : index
    %0 = vector.load %arg1[%c0, %c0_0] : memref<8x8xf32, #tpu.memory_space<vmem>>, vector<8x8xf32>
    %c0_1 = arith.constant 0 : index
    %c0_2 = arith.constant 0 : index
    %1 = vector.load %arg3[%c0_1, %c0_2] : memref<1x128xf32, #tpu.memory_space<vmem>>, vector<1x128xf32>
    %c0_3 = arith.constant 0 : index
    %c0_4 = arith.constant 0 : index
    %2 = vector.load %arg5[%c0_3, %c0_4] : memref<1x128xf32, #tpu.memory_space<vmem>>, vector<1x128xf32>
    %c0_5 = arith.constant 0 : index
    %c0_6 = arith.constant 0 : index
    %3 = vector.load %arg7[%c0_5, %c0_6] : memref<1x128xf32, #tpu.memory_space<vmem>>, vector<1x128xf32>
    %c0_7 = arith.constant 0 : index
    %c0_8 = arith.constant 0 : index
    %4 = vector.load %arg2[%c0_7, %c0_8] : memref<8x128xf32, #tpu.memory_space<vmem>>, vector<8x128xf32>
    %cst = arith.constant dense<0.000000e+00> : vector<8x128xf32>
    %5 = tpu.matmul %0, %4, %cst {dimension_numbers = #tpu.dot_dimension_numbers<[1], [0], [0], [1], [0, 0, 1, 1], [], []>} : vector<8x8xf32>, vector<8x128xf32>, vector<8x128xf32> -> vector<8x128xf32>
    %6 = vector.broadcast %1 : vector<1x128xf32> to vector<8x128xf32>
    %7 = arith.addf %5, %6 : vector<8x128xf32>
    %cst_9 = arith.constant 0.000000e+00 : f32
    %8 = vector.broadcast %cst_9 : f32 to vector<8x128xf32>
    %9 = arith.maximumf %7, %8 : vector<8x128xf32>
    %c0_10 = arith.constant 0 : index
    %c0_11 = arith.constant 0 : index
    %10 = vector.load %arg4[%c0_10, %c0_11] : memref<128x128xf32, #tpu.memory_space<vmem>>, vector<128x128xf32>
    %cst_12 = arith.constant dense<0.000000e+00> : vector<8x128xf32>
    %11 = tpu.matmul %9, %10, %cst_12 {dimension_numbers = #tpu.dot_dimension_numbers<[1], [0], [0], [1], [0, 0, 1, 1], [], []>} : vector<8x128xf32>, vector<128x128xf32>, vector<8x128xf32> -> vector<8x128xf32>
    %12 = vector.broadcast %2 : vector<1x128xf32> to vector<8x128xf32>
    %13 = arith.addf %11, %12 : vector<8x128xf32>
    %cst_13 = arith.constant 0.000000e+00 : f32
    %14 = vector.broadcast %cst_13 : f32 to vector<8x128xf32>
    %15 = arith.maximumf %13, %14 : vector<8x128xf32>
    %c0_14 = arith.constant 0 : index
    %c0_15 = arith.constant 0 : index
    %16 = vector.load %arg6[%c0_14, %c0_15] : memref<128x128xf32, #tpu.memory_space<vmem>>, vector<128x128xf32>
    %cst_16 = arith.constant dense<0.000000e+00> : vector<8x128xf32>
    %17 = tpu.matmul %15, %16, %cst_16 {dimension_numbers = #tpu.dot_dimension_numbers<[1], [0], [0], [1], [0, 0, 1, 1], [], []>} : vector<8x128xf32>, vector<128x128xf32>, vector<8x128xf32> -> vector<8x128xf32>
    %18 = vector.broadcast %3 : vector<1x128xf32> to vector<8x128xf32>
    %19 = arith.addf %17, %18 : vector<8x128xf32>
    %c0_17 = arith.constant 0 : index
    %c0_18 = arith.constant 0 : index
    %20 = vector.load %arg8[%c0_17, %c0_18] : memref<8x128xf32, #tpu.memory_space<vmem>>, vector<8x128xf32>
    tpu.vector_store %arg8[%c0_17, %c0_18], %19 {strides = array<i32>} : memref<8x128xf32, #tpu.memory_space<vmem>>, vector<8x128xf32>,
    return
  }
  func.func @transform_0(%arg0: i32) -> (i32, i32) {
    %c0_i32 = arith.constant 0 : i32
    %c0_i32_0 = arith.constant 0 : i32
    return %arg0, %c0_i32 : i32, i32
  }
  func.func @transform_1(%arg0: i32) -> (i32, i32) {
    %c0_i32 = arith.constant 0 : i32
    %c0_i32_0 = arith.constant 0 : i32
    %c0_i32_1 = arith.constant 0 : i32
    return %c0_i32, %c0_i32_0 : i32, i32
  }
  func.func @transform_2(%arg0: i32) -> (i32, i32) {
    %c0_i32 = arith.constant 0 : i32
    %c0_i32_0 = arith.constant 0 : i32
    %c0_i32_1 = arith.constant 0 : i32
    return %c0_i32, %c0_i32_0 : i32, i32
  }
  func.func @transform_3(%arg0: i32) -> (i32, i32) {
    %c0_i32 = arith.constant 0 : i32
    %c0_i32_0 = arith.constant 0 : i32
    %c0_i32_1 = arith.constant 0 : i32
    return %c0_i32, %c0_i32_0 : i32, i32
  }
  func.func @transform_4(%arg0: i32) -> (i32, i32) {
    %c0_i32 = arith.constant 0 : i32
    %c0_i32_0 = arith.constant 0 : i32
    %c0_i32_1 = arith.constant 0 : i32
    return %c0_i32, %c0_i32_0 : i32, i32
  }
  func.func @transform_5(%arg0: i32) -> (i32, i32) {
    %c0_i32 = arith.constant 0 : i32
    %c0_i32_0 = arith.constant 0 : i32
    %c0_i32_1 = arith.constant 0 : i32
    return %c0_i32, %c0_i32_0 : i32, i32
  }
  func.func @transform_6(%arg0: i32) -> (i32, i32) {
    %c0_i32 = arith.constant 0 : i32
    %c0_i32_0 = arith.constant 0 : i32
    %c0_i32_1 = arith.constant 0 : i32
    return %c0_i32, %c0_i32_0 : i32, i32
  }
  func.func @transform_7(%arg0: i32) -> (i32, i32) {
    %c0_i32 = arith.constant 0 : i32
    %c0_i32_0 = arith.constant 0 : i32
    return %arg0, %c0_i32 : i32, i32
  }
}

</mosaic_0001>

<bundles_post_ra>
// kernel: qnetwork_forward.1
= control target key start
LH: loop header
LB: loop body
LE: loop exit
PB: predicated region body
PF: predicated region fallthrough
CT: control target
= control target key end

     0   :  { %vm34_vm0 = vcmask 64512   ;;  %s301_s1 = inlined_call_operand.vmem [shape: f32[8,128], index: 1, kind: input, shape index: {}]   ;;  %s302_s0 = inlined_call_operand.vmem [shape: f32[8,8], index: 0, kind: input, shape index: {}]   ;;  %s303_s3 = inlined_call_operand.vmem [shape: f32[128,128], index: 3, kind: input, shape index: {}]   ;;  %s304_s2 = inlined_call_operand.vmem [shape: f32[1,128], index: 2, kind: input, shape index: {}]   ;;  %s305_s4 = inlined_call_operand.vmem [shape: f32[1,128], index: 4, kind: input, shape index: {}]   ;;  %s306_s5 = inlined_call_operand.vmem [shape: f32[128,128], index: 5, kind: input, shape index: {}]   ;;  %s307_s6 = inlined_call_operand.vmem [shape: f32[1,128], index: 6, kind: input, shape index: {}]   ;;  %s308_s7 = inlined_call_operand.vmem [shape: f32[8,128], index: 7, kind: output, shape index: {}]  }
   0x1   :  { %v30_v0 = vld [vmem:[%s301_s1] sm:$0xff]  ;;  %v74_v2 = vld [vmem:[%s303_s3 + $0x78] sm:$0xff]  ;;  %v73_v3 = vld [vmem:[%s303_s3 + $0x70] sm:$0xff] }
   0x2   :  { %v26_v1 = vld [vmem:[%s302_s0] sm:$0xff]  ;;  %53 = vmatpush.msra.mxu0 %v30_v0  ;;  %78 = vmatpush.msra.mxu1 %v74_v2  ;;  %v72_v4 = vld [vmem:[%s303_s3 + $0x68] sm:$0xff]  ;;  %v70_v6 = vld [vmem:[%s303_s3 + $0x58] sm:$0xff] }
   0x3   :  { %143 = vmatmul.msk.f32.vlgmr.msra.gmra.mxu0 %vm34_vm0, %v26_v1  ;;  %v71_v5 = vld [vmem:[%s303_s3 + $0x60] sm:$0xff]  ;;  %v69_v7 = vld [vmem:[%s303_s3 + $0x50] sm:$0xff]  ;;  %v68_v8 = vld [vmem:[%s303_s3 + $0x48] sm:$0xff] }
   0x4   :  { %79 = vmatpush.msra.mxu1 %v73_v3  ;;  %v67_v9 = vld [vmem:[%s303_s3 + $0x40] sm:$0xff]  ;;  %v66_v10 = vld [vmem:[%s303_s3 + $0x38] sm:$0xff]  ;;  %v65_v11 = vld [vmem:[%s303_s3 + $0x30] sm:$0xff] }
   0x5   :  { %v64_v12 = vld [vmem:[%s303_s3 + $0x28] sm:$0xff]  ;;  %v63_v13 = vld [vmem:[%s303_s3 + $0x20] sm:$0xff]  ;;  %v62_v14 = vld [vmem:[%s303_s3 + $0x18] sm:$0xff] }
   0x6   :  { %80 = vmatpush.msra.mxu1 %v72_v4  ;;  %v61_v15 = vld [vmem:[%s303_s3 + $0x10] sm:$0xff]  ;;  %v60_v16 = vld [vmem:[%s303_s3 + $0x8] sm:$0xff]  ;;  %v59_v17 = vld [vmem:[%s303_s3] sm:$0xff] }
   0x7   :  { %v114_v18 = vld [vmem:[%s306_s5 + $0x78] sm:$0xff]  ;;  %v113_v19 = vld [vmem:[%s306_s5 + $0x70] sm:$0xff]  ;;  %v112_v20 = vld [vmem:[%s306_s5 + $0x68] sm:$0xff] }
   0x8   :  { %81 = vmatpush.msra.mxu1 %v71_v5  ;;  %118 = vmatpush.msra.mxu2 %v114_v18  ;;  %v111_v21 = vld [vmem:[%s306_s5 + $0x60] sm:$0xff]  ;;  %v110_v22 = vld [vmem:[%s306_s5 + $0x58] sm:$0xff]  ;;  %v109_v23 = vld [vmem:[%s306_s5 + $0x50] sm:$0xff] }
   0x9   :  { %v108_v24 = vld [vmem:[%s306_s5 + $0x48] sm:$0xff]  ;;  %v107_v25 = vld [vmem:[%s306_s5 + $0x40] sm:$0xff]  ;;  %v106_v26 = vld [vmem:[%s306_s5 + $0x38] sm:$0xff] }
   0xa   :  { %82 = vmatpush.msra.mxu1 %v70_v6  ;;  %119 = vmatpush.msra.mxu2 %v113_v19  ;;  %v105_v27 = vld [vmem:[%s306_s5 + $0x30] sm:$0xff]  ;;  %v104_v28 = vld [vmem:[%s306_s5 + $0x28] sm:$0xff]  ;;  %v103_v29 = vld [vmem:[%s306_s5 + $0x20] sm:$0xff] }
   0xb   :  { %v102_v30 = vld [vmem:[%s306_s5 + $0x18] sm:$0xff]  ;;  %v144_v31 = vld [vmem:[%s304_s2] ss:$0 sm:$0xff]  ;;  %v101_v35 = vld [vmem:[%s306_s5 + $0x10] sm:$0xff] }
   0xc   :  { %83 = vmatpush.msra.mxu1 %v69_v7  ;;  %120 = vmatpush.msra.mxu2 %v112_v20  ;;  %v100_v36 = vld [vmem:[%s306_s5 + $0x8] sm:$0xff]  ;;  %v99_v37 = vld [vmem:[%s306_s5] sm:$0xff] }
   0xd   :  { %v145_v38 = vld [vmem:[%s305_s4] ss:$0 sm:$0xff] }
   0xe   :  { %84 = vmatpush.msra.mxu1 %v68_v8  ;;  %121 = vmatpush.msra.mxu2 %v111_v21  ;;  %v146_v42 = vld [vmem:[%s307_s6] ss:$0 sm:$0xff] }
  0x10   :  { %85 = vmatpush.msra.mxu1 %v67_v9  ;;  %122 = vmatpush.msra.mxu2 %v110_v22 }
  0x12   :  { %86 = vmatpush.msra.mxu1 %v66_v10  ;;  %123 = vmatpush.msra.mxu2 %v109_v23 }
  0x14   :  { %87 = vmatpush.msra.mxu1 %v65_v11  ;;  %124 = vmatpush.msra.mxu2 %v108_v24 }
  0x16   :  { %88 = vmatpush.msra.mxu1 %v64_v12  ;;  %125 = vmatpush.msra.mxu2 %v107_v25 }
  0x18   :  { %89 = vmatpush.msra.mxu1 %v63_v13  ;;  %126 = vmatpush.msra.mxu2 %v106_v26 }
  0x1a   :  { %90 = vmatpush.msra.mxu1 %v62_v14  ;;  %127 = vmatpush.msra.mxu2 %v105_v27 }
  0x1c   :  { %91 = vmatpush.msra.mxu1 %v61_v15  ;;  %128 = vmatpush.msra.mxu2 %v104_v28 }
  0x1e   :  { %92 = vmatpush.msra.mxu1 %v60_v16  ;;  %129 = vmatpush.msra.mxu2 %v103_v29 }
  0x20   :  { %93 = vmatpush.msra.mxu1 %v59_v17  ;;  %130 = vmatpush.msra.mxu2 %v102_v30 }
  0x22   :  { %131 = vmatpush.msra.mxu2 %v101_v35 }
  0x24   :  { %132 = vmatpush.msra.mxu2 %v100_v36 }
  0x26   :  { %133 = vmatpush.msra.mxu2 %v99_v37 }
  0x80   :  { %v55_v32 = vpop.f32.mrf.mxu0 }
  0x81   :  { %v56_v33 = vadd.f32 %v144_v31, %v55_v32 }
  0x83   :  { %v58_v34 = vmax.f32 %v56_v33, 0.0 }
  0x85   :  { %94 = vmatmul.f32.vlgmr.msra.gmra.mxu1 %v58_v34 }
 0x102   :  { %v95_v39 = vpop.f32.mrf.mxu1 }
 0x103   :  { %v96_v40 = vadd.f32 %v145_v38, %v95_v39 }
 0x105   :  { %v98_v41 = vmax.f32 %v96_v40, 0.0 }
 0x107   :  { %134 = vmatmul.f32.vlgmr.msra.gmra.mxu2 %v98_v41 }
 0x18a   :  { %v135_v43 = vpop.f32.mrf.mxu2 }
 0x18b   :  { %v136_v44 = vadd.f32 %v146_v42, %v135_v43 }
 0x18d   :  { %138 = vst [vmem:[%s308_s7] sm:$0xff] %v136_v44 }

</bundles_post_ra>
